<compile_context>
chip_gen: v7x
topology: tpu7x:2x2x1
jax: 0.10.0
libtpu: 0.0.40
codegen_flags: <defaults>
</compile_context>

<pallas_src>
import functools
import math

import jax
import jax.numpy as jnp
from jax import lax
from jax.experimental import pallas as pl
from jax.experimental.pallas import tpu as pltpu


def _pick_block(dim, target):
    """Largest divisor of `dim` <= target, preferring sublane-aligned (x8) tiles."""
    fallback = None
    for cand in range(min(dim, target), 0, -1):
        if dim % cand == 0:
            if cand % 8 == 0 or cand == dim:
                return cand
            if fallback is None:
                fallback = cand
    return fallback if fallback is not None else dim


# ---------------------------------------------------------------------------
# Fused QKV projection:  (B, S, H) -> q, k, v each (B, nH, S, D)
#   - weights/bias VMEM-resident (constant index_map)
#   - one (tm, H) x (H, 3D) matmul per (batch, seq-block, head) step
# ---------------------------------------------------------------------------

def _qkv_proj_kernel(x_ref, w_ref, b_ref, q_ref, k_ref, v_ref, *, d):
    h = pl.program_id(2)
    x = x_ref[0]                                   # (tm, H), native dtype
    w = w_ref[h]                                   # (H, 3D) resident slab slice
    y = jnp.dot(x, w, preferred_element_type=jnp.float32) + b_ref[h]   # (tm, 3D)
    q_ref[0, 0] = y[:, 0:d].astype(q_ref.dtype)
    k_ref[0, 0] = y[:, d:2 * d].astype(k_ref.dtype)
    v_ref[0, 0] = y[:, 2 * d:3 * d].astype(v_ref.dtype)


def qkv_projection(x, w_qkv, b_qkv, *, seq_block=256):
    B, S, H = x.shape
    nH, _, threeD = w_qkv.shape
    D = threeD // 3
    tm = _pick_block(S, seq_block)
    grid = (B, S // tm, nH)          # head innermost: x block stays resident.

    x_spec = pl.BlockSpec((1, tm, H), lambda b, si, h: (b, si, 0))
    # Constant index_map -> the full weight / bias slabs are DMA'd once and
    # stay resident in VMEM for the whole kernel.
    w_spec = pl.BlockSpec((nH, H, threeD), lambda b, si, h: (0, 0, 0))
    b_spec = pl.BlockSpec((nH, 1, threeD), lambda b, si, h: (0, 0, 0))
    o_spec = pl.BlockSpec((1, 1, tm, D), lambda b, si, h: (b, h, si, 0))
    out_sd = jax.ShapeDtypeStruct((B, nH, S, D), x.dtype)

    itemsize = jnp.dtype(x.dtype).itemsize
    flops = 2 * B * S * H * 3 * H
    bytes_accessed = itemsize * (B * S * H + 3 * H * H + 3 * B * S * H)

    return pl.pallas_call(
        functools.partial(_qkv_proj_kernel, d=D),
        out_shape=(out_sd, out_sd, out_sd),
        grid=grid,
        in_specs=[x_spec, w_spec, b_spec],
        out_specs=(o_spec, o_spec, o_spec),
        compiler_params=pltpu.CompilerParams(
            dimension_semantics=("parallel", "parallel", "parallel"),
            vmem_limit_bytes=48 * 1024 * 1024),
        cost_estimate=pl.CostEstimate(flops=flops, transcendentals=0,
                                      bytes_accessed=bytes_accessed),
    )(x, w_qkv, b_qkv)


# ---------------------------------------------------------------------------
# Flash-style causal attention:  q, k, v (B, nH, S, D) -> (B, nH, S, D)
#   - grid enumerates only lower-triangular (qi, ki) block pairs (SMEM tables)
#   - causal mask applied only on diagonal blocks
# ---------------------------------------------------------------------------

def _flash_causal_attn_kernel(qi_tbl_ref, ki_tbl_ref, q_ref, k_ref, v_ref,
                              o_ref, m_sc, l_sc, acc_sc, *, scale, tq, tk):
    t = pl.program_id(2)
    qi = qi_tbl_ref[t]
    ki = ki_tbl_ref[t]

    @pl.when(ki == 0)                          # first kv block of this q row
    def _init():
        m_sc[...] = jnp.full_like(m_sc, -jnp.inf)
        l_sc[...] = jnp.zeros_like(l_sc)
        acc_sc[...] = jnp.zeros_like(acc_sc)

    def scores():
        return lax.dot_general(q_ref[0, 0], k_ref[0, 0],
                               (((1,), (1,)), ((), ())),
                               preferred_element_type=jnp.float32) * scale

    def update(s):                              # online-softmax accumulate
        m_prev = m_sc[...]                                        # (tq, 1) f32
        m_new = jnp.maximum(m_prev, jnp.max(s, axis=-1, keepdims=True))
        alpha = jnp.exp(m_prev - m_new)
        p = jnp.exp(s - m_new)
        l_sc[...] = alpha * l_sc[...] + jnp.sum(p, axis=-1, keepdims=True)
        acc_sc[...] = alpha * acc_sc[...] + jnp.dot(
            p.astype(v_ref.dtype), v_ref[0, 0],
            preferred_element_type=jnp.float32)
        m_sc[...] = m_new

    @pl.when(ki < qi)                           # strictly below the diagonal:
    def _full_block():                          # no mask arithmetic needed
        update(scores())

    @pl.when(ki == qi)                          # diagonal block: mask + finalize
    def _diag_block():
        s = scores()
        row = lax.broadcasted_iota(jnp.int32, (tq, tk), 0)
        col = lax.broadcasted_iota(jnp.int32, (tq, tk), 1)
        s = jnp.where(row >= col, s, jnp.float32(-1e30))   # tq == tk, same base
        update(s)
        # The diagonal block is the last kv block for this q row.
        inv_l = pl.reciprocal(l_sc[...], approx=True)       # EUP slot, ~free
        o_ref[0, 0] = (acc_sc[...] * inv_l).astype(o_ref.dtype)


def causal_flash_attention(q, k, v, *, q_block=256):
    B, nH, S, D = q.shape
    tq = _pick_block(S, q_block)     # 256 default (v6e/v7x MXU width);
    tk = tq                          # drop q_block to 128 on v5e if desired.
    nq = S // tq
    scale = 1.0 / math.sqrt(D)

    # Lower-triangular block-pair enumeration: for each q row, ki = 0..qi
    # (diagonal last).  Only these pairs become grid steps: no no-op steps.
    pairs = [(qi, ki) for qi in range(nq) for ki in range(qi + 1)]
    qi_tbl = jnp.asarray([p[0] for p in pairs], dtype=jnp.int32)
    ki_tbl = jnp.asarray([p[1] for p in pairs], dtype=jnp.int32)
    T = len(pairs)

    q_spec = pl.BlockSpec((1, 1, tq, D),
                          lambda b, h, t, qi_t, ki_t: (b, h, qi_t[t], 0))
    kv_spec = pl.BlockSpec((1, 1, tk, D),
                           lambda b, h, t, qi_t, ki_t: (b, h, ki_t[t], 0))
    o_spec = pl.BlockSpec((1, 1, tq, D),
                          lambda b, h, t, qi_t, ki_t: (b, h, qi_t[t], 0))

    itemsize = jnp.dtype(q.dtype).itemsize
    flops = 2 * B * nH * D * S * (S + tq)          # QK^T + PV over the triangle
    transcendentals = B * nH * S * (S + tq) // 2
    bytes_accessed = 4 * itemsize * B * nH * S * D

    grid_spec = pltpu.PrefetchScalarGridSpec(
        num_scalar_prefetch=2,
        grid=(B, nH, T),
        in_specs=[q_spec, kv_spec, kv_spec],
        out_specs=o_spec,
        scratch_shapes=[pltpu.VMEM((tq, 1), jnp.float32),    # m
                        pltpu.VMEM((tq, 1), jnp.float32),    # l
                        pltpu.VMEM((tq, D), jnp.float32)])   # acc

    return pl.pallas_call(
        functools.partial(_flash_causal_attn_kernel, scale=scale, tq=tq, tk=tk),
        out_shape=jax.ShapeDtypeStruct((B, nH, S, D), q.dtype),
        grid_spec=grid_spec,
        compiler_params=pltpu.CompilerParams(
            dimension_semantics=("parallel", "parallel", "arbitrary"),
            vmem_limit_bytes=32 * 1024 * 1024),
        cost_estimate=pl.CostEstimate(flops=flops,
                                      transcendentals=transcendentals,
                                      bytes_accessed=bytes_accessed),
    )(qi_tbl, ki_tbl, q, k, v)


# ---------------------------------------------------------------------------
# Fused head-merge + out_proj:  (B, nH, S, D) -> (B, S, H)
#   - full (nH, D, H) weight resident, head reduction chained inside the body
#   - single lane-dense (tm, H) store per step, no accumulator scratch
# ---------------------------------------------------------------------------

def _out_proj_kernel(a_ref, w_ref, b_ref, o_ref, *, n_heads):
    acc = b_ref[...].astype(jnp.float32)                       # (1, H)
    for h in range(n_heads):                                    # static unroll
        acc = acc + jnp.dot(a_ref[0, h], w_ref[h],
                            preferred_element_type=jnp.float32)
    o_ref[0] = acc.astype(o_ref.dtype)


def out_projection(attn, wo, bo, *, seq_block=256):
    B, nH, S, D = attn.shape
    H = wo.shape[-1]
    tm = _pick_block(S, seq_block)
    grid = (B, S // tm)

    a_spec = pl.BlockSpec((1, nH, tm, D), lambda b, si: (b, 0, si, 0))
    w_spec = pl.BlockSpec((nH, D, H), lambda b, si: (0, 0, 0))   # resident
    b_spec = pl.BlockSpec((1, H), lambda b, si: (0, 0))          # resident
    o_spec = pl.BlockSpec((1, tm, H), lambda b, si: (b, si, 0))

    itemsize = jnp.dtype(attn.dtype).itemsize
    flops = 2 * B * S * H * H
    bytes_accessed = itemsize * (2 * B * S * H + H * H)

    return pl.pallas_call(
        functools.partial(_out_proj_kernel, n_heads=nH),
        out_shape=jax.ShapeDtypeStruct((B, S, H), attn.dtype),
        grid=grid,
        in_specs=[a_spec, w_spec, b_spec],
        out_specs=o_spec,
        compiler_params=pltpu.CompilerParams(
            dimension_semantics=("parallel", "parallel"),
            vmem_limit_bytes=48 * 1024 * 1024),
        cost_estimate=pl.CostEstimate(flops=flops, transcendentals=0,
                                      bytes_accessed=bytes_accessed),
    )(attn, wo, bo.reshape(1, H))


# ---------------------------------------------------------------------------
# Module forward (BarkSelfAttention with causal SDPA, eval mode)
# ---------------------------------------------------------------------------

def bark_attention_forward(hidden_states, params, num_heads, compute_dtype=None):
    """hidden_states: (B, S, H) -> (B, S, H).

    compute_dtype: optionally cast activations/weights (e.g. jnp.bfloat16) to
    halve HBM traffic; softmax state and matmul accumulation stay f32.
    """
    B, S, H = hidden_states.shape
    D = H // num_heads

    att_w = params["att_proj_w"]
    att_b = params["att_proj_b"]
    out_w = params["out_proj_w"]
    out_b = params["out_proj_b"]
    if compute_dtype is not None:
        hidden_states = hidden_states.astype(compute_dtype)
        att_w = att_w.astype(compute_dtype)
        out_w = out_w.astype(compute_dtype)

    # One-time parameter repack into per-head slabs (weights only; no
    # activation split/transpose passes over HBM).
    wq, wk, wv = jnp.split(att_w, 3, axis=1)                    # (H, H) each
    bq, bk, bv = jnp.split(att_b, 3, axis=0)                    # (H,)  each

    def per_head_w(wi):   # (H, H) -> (nH, H, D)
        return wi.reshape(H, num_heads, D).transpose(1, 0, 2)

    def per_head_b(bi):   # (H,) -> (nH, 1, D)
        return bi.reshape(num_heads, 1, D)

    w_qkv = jnp.concatenate(
        [per_head_w(wq), per_head_w(wk), per_head_w(wv)], axis=-1)  # (nH, H, 3D)
    b_qkv = jnp.concatenate(
        [per_head_b(bq), per_head_b(bk), per_head_b(bv)], axis=-1)  # (nH, 1, 3D)

    q, k, v = qkv_projection(hidden_states, w_qkv, b_qkv)       # (B, nH, S, D)
    attn = causal_flash_attention(q, k, v)                      # (B, nH, S, D)

    wo = out_w.reshape(num_heads, D, H)                         # (nH, D, H)
    return out_projection(attn, wo, out_b)                      # (B, S, H)


# ---------------------------------------------------------------------------
# Pure-JAX reference for correctness check
# ---------------------------------------------------------------------------

def reference_forward(hidden_states, params, num_heads):
    B, S, H = hidden_states.shape
    D = H // num_heads
    qkv = hidden_states @ params["att_proj_w"] + params["att_proj_b"]
    q, k, v = jnp.split(qkv, 3, axis=-1)
    q = q.reshape(B, S, num_heads, D).transpose(0, 2, 1, 3)
    k = k.reshape(B, S, num_heads, D).transpose(0, 2, 1, 3)
    v = v.reshape(B, S, num_heads, D).transpose(0, 2, 1, 3)
    s = jnp.einsum("bhqd,bhkd->bhqk", q, k) / math.sqrt(D)
    mask = jnp.tril(jnp.ones((S, S), dtype=bool))
    s = jnp.where(mask[None, None], s, -1e30)
    p = jax.nn.softmax(s, axis=-1)
    o = jnp.einsum("bhqk,bhkd->bhqd", p, v)
    o = o.transpose(0, 2, 1, 3).reshape(B, S, H)
    return o @ params["out_proj_w"] + params["out_proj_b"]


# ---------------------------------------------------------------------------
# main
# ---------------------------------------------------------------------------

if __name__ == "__main__":
    # Small shapes consistent with Bark attention.
    B, S, H, NUM_HEADS = 2, 8, 32, 4

    key = jax.random.PRNGKey(0)
    k_x, k_w1, k_b1, k_w2, k_b2 = jax.random.split(key, 5)

    hidden_states = jax.random.normal(k_x, (B, S, H), dtype=jnp.float32)

    # Weights stored already transposed relative to torch Linear: (in, out).
    params = {
        "att_proj_w": jax.random.normal(k_w1, (H, 3 * H), dtype=jnp.float32) * 0.05,
        "att_proj_b": jax.random.normal(k_b1, (3 * H,), dtype=jnp.float32) * 0.05,
        "out_proj_w": jax.random.normal(k_w2, (H, H), dtype=jnp.float32) * 0.05,
        "out_proj_b": jax.random.normal(k_b2, (H,), dtype=jnp.float32) * 0.05,
    }

    out = bark_attention_forward(hidden_states, params, NUM_HEADS)
    out = jax.block_until_ready(out)

    ref = reference_forward(hidden_states, params, NUM_HEADS)
    assert out.shape == (B, S, H)
    # Slightly relaxed tolerance: the flash finalize uses the EUP approximate
    # reciprocal (~1e-4 relative error); everything else is f32-accumulated.
    assert jnp.allclose(out, ref, atol=2e-3, rtol=2e-3), "mismatch vs reference"

    print("KERNEL_OK")
</pallas_src>

<mosaic_0001>
module attributes {stable_mosaic.version = 11 : i64} {
  func.func @_qkv_proj_kernel(%arg0: i32, %arg1: i32, %arg2: i32, %arg3: memref<1x8x32xf32, #tpu.memory_space<vmem>>, %arg4: memref<4x32x24xf32, #tpu.memory_space<vmem>>, %arg5: memref<4x1x24xf32, #tpu.memory_space<vmem>>, %arg6: memref<1x1x8x8xf32, #tpu.memory_space<vmem>>, %arg7: memref<1x1x8x8xf32, #tpu.memory_space<vmem>>, %arg8: memref<1x1x8x8xf32, #tpu.memory_space<vmem>>) attributes {dimension_semantics = [#tpu.dimension_semantics<parallel>, #tpu.dimension_semantics<parallel>, #tpu.dimension_semantics<parallel>], iteration_bounds = array<i64: 2, 1, 4>, scalar_prefetch = 0 : i64, scratch_operands = 0 : i64, tpu.core_type = #tpu.core_type<tc>, window_params = [{transform_indices = @transform_0, window_bounds = array<i64: 1, 8, 32>}, {pipeline_mode = #tpu.pipeline_mode<synchronous>, transform_indices = @transform_1, window_bounds = array<i64: 4, 32, 24>}, {pipeline_mode = #tpu.pipeline_mode<synchronous>, transform_indices = @transform_2, window_bounds = array<i64: 4, 1, 24>}, {transform_indices = @transform_3, window_bounds = array<i64: 1, 1, 8, 8>}, {transform_indices = @transform_4, window_bounds = array<i64: 1, 1, 8, 8>}, {transform_indices = @transform_5, window_bounds = array<i64: 1, 1, 8, 8>}]} {
    %c0 = arith.constant 0 : index
    %c0_0 = arith.constant 0 : index
    %c0_1 = arith.constant 0 : index
    %0 = vector.load %arg3[%c0, %c0_0, %c0_1] : memref<1x8x32xf32, #tpu.memory_space<vmem>>, vector<1x8x32xf32>
    %1 = vector.shape_cast %0 : vector<1x8x32xf32> to vector<8x32xf32>
    %2 = arith.index_cast %arg2 : i32 to index
    %c0_2 = arith.constant 0 : index
    %c0_3 = arith.constant 0 : index
    %3 = vector.load %arg4[%2, %c0_2, %c0_3] : memref<4x32x24xf32, #tpu.memory_space<vmem>>, vector<1x32x24xf32>
    %4 = vector.shape_cast %3 : vector<1x32x24xf32> to vector<32x24xf32>
    %cst = arith.constant dense<0.000000e+00> : vector<8x24xf32>
    %5 = tpu.matmul %1, %4, %cst {dimension_numbers = #tpu.dot_dimension_numbers<[1], [0], [0], [1], [0, 0, 1, 1], [], []>} : vector<8x32xf32>, vector<32x24xf32>, vector<8x24xf32> -> vector<8x24xf32>
    %6 = arith.index_cast %arg2 : i32 to index
    %c0_4 = arith.constant 0 : index
    %c0_5 = arith.constant 0 : index
    %7 = vector.load %arg5[%6, %c0_4, %c0_5] : memref<4x1x24xf32, #tpu.memory_space<vmem>>, vector<1x1x24xf32>
    %8 = vector.shape_cast %7 : vector<1x1x24xf32> to vector<1x24xf32>
    %9 = vector.broadcast %8 : vector<1x24xf32> to vector<8x24xf32>
    %10 = arith.addf %5, %9 : vector<8x24xf32>
    %11 = vector.extract_strided_slice %10 {offsets = [0, 0], sizes = [8, 8], strides = [1, 1]} : vector<8x24xf32> to vector<8x8xf32>
    %c0_6 = arith.constant 0 : index
    %c0_7 = arith.constant 0 : index
    %c0_8 = arith.constant 0 : index
    %c0_9 = arith.constant 0 : index
    %12 = vector.load %arg6[%c0_6, %c0_7, %c0_8, %c0_9] : memref<1x1x8x8xf32, #tpu.memory_space<vmem>>, vector<1x1x8x8xf32>
    %13 = vector.shape_cast %12 : vector<1x1x8x8xf32> to vector<8x8xf32>
    %14 = vector.shape_cast %11 : vector<8x8xf32> to vector<1x1x8x8xf32>
    tpu.vector_store %arg6[%c0_6, %c0_7, %c0_8, %c0_9], %14 {strides = array<i32>} : memref<1x1x8x8xf32, #tpu.memory_space<vmem>>, vector<1x1x8x8xf32>,
    %15 = vector.extract_strided_slice %10 {offsets = [0, 8], sizes = [8, 8], strides = [1, 1]} : vector<8x24xf32> to vector<8x8xf32>
    %c0_10 = arith.constant 0 : index
    %c0_11 = arith.constant 0 : index
    %c0_12 = arith.constant 0 : index
    %c0_13 = arith.constant 0 : index
    %16 = vector.load %arg7[%c0_10, %c0_11, %c0_12, %c0_13] : memref<1x1x8x8xf32, #tpu.memory_space<vmem>>, vector<1x1x8x8xf32>
    %17 = vector.shape_cast %16 : vector<1x1x8x8xf32> to vector<8x8xf32>
    %18 = vector.shape_cast %15 : vector<8x8xf32> to vector<1x1x8x8xf32>
    tpu.vector_store %arg7[%c0_10, %c0_11, %c0_12, %c0_13], %18 {strides = array<i32>} : memref<1x1x8x8xf32, #tpu.memory_space<vmem>>, vector<1x1x8x8xf32>,
    %19 = vector.extract_strided_slice %10 {offsets = [0, 16], sizes = [8, 8], strides = [1, 1]} : vector<8x24xf32> to vector<8x8xf32>
    %c0_14 = arith.constant 0 : index
    %c0_15 = arith.constant 0 : index
    %c0_16 = arith.constant 0 : index
    %c0_17 = arith.constant 0 : index
    %20 = vector.load %arg8[%c0_14, %c0_15, %c0_16, %c0_17] : memref<1x1x8x8xf32, #tpu.memory_space<vmem>>, vector<1x1x8x8xf32>
    %21 = vector.shape_cast %20 : vector<1x1x8x8xf32> to vector<8x8xf32>
    %22 = vector.shape_cast %19 : vector<8x8xf32> to vector<1x1x8x8xf32>
    tpu.vector_store %arg8[%c0_14, %c0_15, %c0_16, %c0_17], %22 {strides = array<i32>} : memref<1x1x8x8xf32, #tpu.memory_space<vmem>>, vector<1x1x8x8xf32>,
    return
  }
  func.func @transform_0(%arg0: i32, %arg1: i32, %arg2: i32) -> (i32, i32, i32) {
    %c0_i32 = arith.constant 0 : i32
    %c0_i32_0 = arith.constant 0 : i32
    return %arg0, %arg1, %c0_i32 : i32, i32, i32
  }
  func.func @transform_1(%arg0: i32, %arg1: i32, %arg2: i32) -> (i32, i32, i32) {
    %c0_i32 = arith.constant 0 : i32
    %c0_i32_0 = arith.constant 0 : i32
    %c0_i32_1 = arith.constant 0 : i32
    %c0_i32_2 = arith.constant 0 : i32
    return %c0_i32, %c0_i32_0, %c0_i32_1 : i32, i32, i32
  }
  func.func @transform_2(%arg0: i32, %arg1: i32, %arg2: i32) -> (i32, i32, i32) {
    %c0_i32 = arith.constant 0 : i32
    %c0_i32_0 = arith.constant 0 : i32
    %c0_i32_1 = arith.constant 0 : i32
    %c0_i32_2 = arith.constant 0 : i32
    return %c0_i32, %c0_i32_0, %c0_i32_1 : i32, i32, i32
  }
  func.func @transform_3(%arg0: i32, %arg1: i32, %arg2: i32) -> (i32, i32, i32, i32) {
    %c0_i32 = arith.constant 0 : i32
    %c0_i32_0 = arith.constant 0 : i32
    return %arg0, %arg2, %arg1, %c0_i32 : i32, i32, i32, i32
  }
  func.func @transform_4(%arg0: i32, %arg1: i32, %arg2: i32) -> (i32, i32, i32, i32) {
    %c0_i32 = arith.constant 0 : i32
    %c0_i32_0 = arith.constant 0 : i32
    return %arg0, %arg2, %arg1, %c0_i32 : i32, i32, i32, i32
  }
  func.func @transform_5(%arg0: i32, %arg1: i32, %arg2: i32) -> (i32, i32, i32, i32) {
    %c0_i32 = arith.constant 0 : i32
    %c0_i32_0 = arith.constant 0 : i32
    return %arg0, %arg2, %arg1, %c0_i32 : i32, i32, i32, i32
  }
}

</mosaic_0001>

<bundles_post_ra>
// kernel: tpu_custom_call.1
= control target key start
LH: loop header
LB: loop body
LE: loop exit
PB: predicated region body
PF: predicated region fallthrough
CT: control target
= control target key end

     0   :  { %11 = vsyncpa [#allocation3], 0  ;;  %s1147_s0 = inlined_call_operand.vmem [shape: f32[2,8,32], index: 0, kind: input, shape index: {}]   ;;  %s1148_s1 = inlined_call_operand.vmem [shape: f32[4,32,24], index: 1, kind: input, shape index: {}]   ;;  %s1149_s2 = inlined_call_operand.vmem [shape: f32[4,1,24], index: 2, kind: input, shape index: {}]   ;;  %s1150_s3 = inlined_call_operand.hbm [shape: f32[2,4,8,8], index: 3, kind: output, shape index: {0}]   ;;  %s1151_s4 = inlined_call_operand.hbm [shape: f32[2,4,8,8], index: 4, kind: output, shape index: {1}]   ;;  %s1152_s5 = inlined_call_operand.hbm [shape: f32[2,4,8,8], index: 5, kind: output, shape index: {2}]  }
   0x1   :  { %13 = vsyncpa [#allocation3 + $0x1], 0 }
   0x2   :  { %14 = vsyncpa [#allocation5], 0 }
   0x3   :  { %16 = vsyncpa [#allocation5 + $0x1], 0  ;;  %s913_s18 = smov 0   ;;  %s915_s19 = smov 0  }
   0x4   :  { %s917_s20 = smov 0   ;;  %s919_s21 = smov 0  }
   0x5   :  { %s921_s22 = smov 0   ;;  %s923_s23 = smov 0  }
   0x6   :  { %s925_s24 = smov 0   ;;  %s927_s25 = smov 0  }
   0x7 LB: > { %s1154_s26 = sadd.s32 4294967295, %s873_s25   ;;  %s1153_s27 = sadd.s32 4294967294, %s873_s25   ;;  %s873_s25 = sphi %s927_s25, %s22_s25   ;;  %s869_s24 = sphi %s925_s24, %s1169_s24   ;;  %s865_s23 = sphi %s923_s23, %s1168_s23   ;;  %s861_s22 = sphi %s921_s22, %s1167_s22   ;;  %s857_s21 = sphi %s919_s21, %s1166_s21   ;;  %s853_s20 = sphi %s917_s20, %s1165_s20   ;;  %s849_s19 = sphi %s915_s19, %s1164_s19   ;;  %s845_s18 = sphi %s913_s18, %s1163_s18  }
   0x8   : > { %s34_s28 = sadd.s32 1, %s865_s23  ;;  %s41_s29 = sadd.s32 1, %s869_s24 }
   0x9   : > { %p35_p0 = scmp.ge.s32.totalorder %s34_s28, 4  ;;  %p132_p1 = scmp.ne.s32.totalorder %s853_s20, %s849_s19 }
   0xa   : > { %p133_p2 = scmp.eq.s32.totalorder %s1154_s26, 7  ;;  %p138_p5 = scmp.ne.s32.totalorder %s849_s19, %s845_s18 }
   0xb   : > { %s1171_s28 = smov (%p35_p0, %s34_s28), 0  ;;  %s1173_s29 = smov (!%p35_p0, %s41_s29), %s869_s24 }
   0xc   : > { %s116_s30 = ssub.s32 %s865_s23, %s1171_s28  ;;  %p966_p3 = por %p133_p2, %p132_p1 }
   0xd   : > { %p43_p4 = scmp.ge.s32.totalorder %s1173_s29, 2  ;;  %p139_p6 = scmp.eq.s32.totalorder %s1153_s27, 7 }
   0xe   : > { %p592_p7 = scmp.ge.s32.totalorder %s873_s25, 1  ;;  %p233_p9 = scmp.lt.s32.totalorder %s873_s25, 9 }
   0xf   : > { %s1175_s29 = smov (%p43_p4, %s1173_s29), 0  ;;  %p977_p8 = por %p139_p6, %p138_p5 }
  0x10   : > { %s115_s8 = ssub.s32 %s869_s24, %s1175_s29  ;;  %s122_s9 = sadd.s32 1, %s853_s20 }
  0x11   : > { %s117_s10 = sor.u32 %s116_s30, %s115_s8  ;;  %p234_p10 = pnand %p592_p7, %p233_p9 }
  0x12   : > { %p120_p11 = scmp.eq.s32.totalorder %s117_s10, 0  ;;  %s597_s12 = sshll.u32 (!%p234_p10), %s857_s21, 5  ;;  %v875_v0 = vmov (!%p234_p10), 0.0|0.0   ;;  %vm876_vm0 = vmmov (!%p234_p10), 0   ;;  %v877_v1 = vmov (!%p234_p10), 0.0   ;;  %vm295_vm1 = vcmask (!%p234_p10), 261120  }
  0x13   : > { %237 = sbr.rel (%p234_p10) target bundleno = 400 (0x190), region = 32  ;;  %p273_p12 = scmp.lt.s32.totalorder (!%p234_p10), %s861_s22, 1  ;;  %627 = vmatprep.subr.bf16.mxu0 (!%p234_p10), %v875_v0  ;;  %624 = vmatprep.mubr.msk.f32.mxu0 (!%p234_p10), %vm876_vm0, %v877_v1  ;;  %vm369_vm2 = vcmask (!%p234_p10), 64512  }
  0x14   : > { %s986_s11 = scalar_select %p120_p11, %s853_s20, %s122_s9  }
  0x15   : > { %s282_s15 = scalar_lea.vmem (!%p234_p10), %s1148_s1, %s597_s12  ;;  %s256_s10 = sand.u32 (!%p234_p10), 1, %s849_s19  }
  0x16   : > { %v283_v2 = vld [vmem:[%s282_s15] sm:$0xff] (!%p234_p10)  ;;  %v284_v3 = vld [vmem:[%s282_s15 + $0x8] sm:$0xff] (!%p234_p10)  ;;  %v285_v4 = vld [vmem:[%s282_s15 + $0x10] sm:$0xff] (!%p234_p10)  ;;  %s603_s12 = sshll.u32 (!%p234_p10), %s861_s22, 2  ;;  %s999_s13 = sshll.u32 (!%p234_p10), %s256_s10, 3 }
  0x17   : > { %v628_v5 = vpack.c.bf16 (!%p234_p10), %v284_v3, %v283_v2  ;;  %v286_v6 = vld [vmem:[%s282_s15 + $0x18] sm:$0xff] (!%p234_p10)  ;;  %s287_s15 = scalar_lea.vmem (!%p234_p10), %s1149_s2, %s857_s21  ;;  %s381_s27 = scalar_lea.sflag (!%p234_p10), [#allocation3], %s256_s10 }
  0x18   : > { %v631_v7 = vpack.c.bf16 (!%p234_p10), %v286_v6, %v285_v4  ;;  %v598_v9 = vld [vmem:[%s287_s15] ss:$0 sm:$0xff] (!%p234_p10)  ;;  %s879_s14 = smov (!%p234_p10), [#allocation2]  }
  0x19   : > { %629 = vmatpush3.bf16.msra.mxu0 (!%p234_p10), %v628_v5  ;;  %s723_s15 = sshll.u32 (!%p234_p10), %s879_s14, 4  ;;  %s724_s15 = int_to_ptr.vmem [resolvable:$false] %s723_s15 }
  0x1a   : > { %s274_s16 = scalar_select %p273_p12, %s861_s22, 1  ;;  %630 = vmatprep.subr.bf16.mxu0 %v875_v0 }
  0x1c   : > { %s596_s17 = sshll.u32 %s274_s16, 3  ;;  %s403_s16 = sadd.s32 %s857_s21, %s603_s12 }
  0x1d   : > { %s279_s9 = scalar_lea.vmem %s1147_s0, %s596_s17  ;;  %632 = vmatpush3.bf16.msra.mxu0 %v631_v7  ;;  %s1006_s26 = sshll.u32 %s403_s16, 7 }
  0x1e   : > { %v280_v8 = vld [vmem:[%s279_s9] sm:$0xff]  ;;  %s258_s17 = scalar_lea.vmem [#allocation2], %s999_s13  ;;  %s1013_s9 = scalar_lea.hbm %s1150_s3, %s1006_s26 }
  0x1f   : > { %s407_s30 = sshll.u32 %s258_s17, 4  ;;  %s878_s21 = smov 120   ;;  %s1015_s30 = int_to_ptr.vmem [resolvable:$true] %s407_s30 }
  0x20   : > { %625 = vmatmul.mubr.msk.f32.vlgmr.msra.gmra.mrb[0].mxu0 %vm295_vm1, %v280_v8  ;;  %s719_s12 = scalar_lea.vmem %s1015_s30, 128  ;;  %s725_s16 = scalar_lea.vmem %s724_s15, 256 }
  0x21   : > { %p720_p13 = scmp.ne.s32.totalorder %s1015_s30, %s719_s12  ;;  %p726_p2 = scmp.lt.s32.totalorder %s1015_s30, %s724_s15 }
  0x22   : > { %p727_p4 = scmp.lt.s32.totalorder %s725_s16, %s719_s12 }
  0x23   : > { %p721_p0 = pnand %p720_p13, %p966_p3 }
  0x24   : > { %p728_p5 = por %p727_p4, %p726_p2 }
  0x25   : > { %p722_p1 = pneg %p721_p0 }
  0x27   : > { %p729_p6 = pnand %p728_p5, %p722_p1 }
  0xf3   : > { %v365_v10 = vpop.f32.mrb[0].mxu0 }
  0xf4   : > { %v366_v11 = vadd.f32 %v598_v9, %v365_v10  ;;  %v626_v12 = vpop.f32.mrb[1].mxu0 }
  0xf6   : > { %372 = vrot.lane.b32.xlu0 %v366_v11, %s878_s21  ;;  %370 = vst.msk [vmem:[%s258_s17] sm:$0xff] %vm369_vm2, %v366_v11 }
  0xf7   : > { %732 = shalt.err (!%p729_p6)
}
  0xf8   : > { %s733_s10 = scalar_lea.hbm %s1013_s9, 128  ;;  %s737_s8 = scalar_lea.hbm %s1150_s3, 1024 }
  0xf9   : > { %p734_p7 = scmp.ne.s32.totalorder %s1013_s9, %s733_s10  ;;  %p738_p11 = scmp.lt.u32.totalorder %s1013_s9, %s1150_s3 }
  0xfa   : > { %p739_p12 = scmp.lt.u32.totalorder %s737_s8, %s733_s10  ;;  %p741_p0 = scmp.lt.u32.totalorder %s733_s10, %s1013_s9 }
  0xfb   : > { %p735_p9 = pnand %p734_p7, %p966_p3 }
  0xfc   : > { %p740_p13 = por %p739_p12, %p738_p11 }
  0xfd   : > { %p736_p10 = pneg %p735_p9 }
  0xfe   : > { %p742_p1 = por %p741_p0, %p740_p13 }
 0x100   : > { %p743_p2 = pnand %p742_p1, %p736_p10 }
 0x102   : > { %746 = shalt.err (!%p743_p2)
}
 0x103   : > { %633 = dma.vmem_to_hbm [thread:$0]  (%p966_p3), %s1015_s30, 128, %s1013_s9, %s381_s27  }
 0x104   : > { %s880_s12 = smov 112   ;;  %s1158_s15 = sadd.s32 4294967295, %s873_s25  }
 0x105   : > { %376 = vrot.lane.b32.xlu0 %v366_v11, %s880_s12  ;;  %s1041_s16 = sand.u32 1, %s1158_s15   ;;  %s265_s10 = scalar_lea.vmem [#allocation4], %s999_s13 }
 0x106   : > { %s423_s17 = sshll.u32 %s265_s10, 4  ;;  %s1048_s21 = scalar_lea.hbm %s1151_s4, %s1006_s26  ;;  %s1050_s17 = int_to_ptr.vmem [resolvable:$true] %s423_s17 }
 0x107   : > { %s1155_s30 = scalar_lea.vmem [#allocation6], %s999_s13  ;;  %s747_s14 = scalar_lea.vmem %s1050_s17, 128 }
 0x108   : > { %s1055_s9 = sshll.u32 %s1155_s30, 4  ;;  %p748_p4 = scmp.ne.s32.totalorder %s1050_s17, %s747_s14  ;;  %s1083_s9 = int_to_ptr.vmem [resolvable:$true] %s1055_s9 }
 0x109   : > { %s881_s12 = smov [#allocation4]  }
 0x10a   : > { %p749_p5 = pnand %p748_p4, %p966_p3  ;;  %s751_s15 = sshll.u32 %s881_s12, 4  ;;  %s752_s15 = int_to_ptr.vmem [resolvable:$false] %s751_s15 }
 0x10b   : > { %s753_s22 = scalar_lea.vmem %s752_s15, 256  ;;  %p754_p7 = scmp.lt.s32.totalorder %s1050_s17, %s752_s15 }
 0x10c   : > { %p750_p6 = pneg %p749_p5  ;;  %p755_p9 = scmp.lt.s32.totalorder %s753_s22, %s747_s14 }
 0x10e   : > { %p756_p10 = por %p755_p9, %p754_p7 }
 0x110   : > { %p757_p11 = pnand %p756_p10, %p750_p6 }
 0x168   : > { %v373_v13 = vpop.permute.xlu0 %372 }
 0x169   : > { %375 = vst.msk [vmem:[%s265_s10] sm:$0xff] %vm369_vm2, %v373_v13 }
 0x16a   : > { %760 = shalt.err (!%p757_p11)
}
 0x16b   : > { %s761_s10 = scalar_lea.hbm %s1048_s21, 128  ;;  %s765_s12 = scalar_lea.hbm %s1151_s4, 1024 }
 0x16c   : > { %p762_p12 = scmp.ne.s32.totalorder %s1048_s21, %s761_s10  ;;  %p766_p1 = scmp.lt.u32.totalorder %s1048_s21, %s1151_s4 }
 0x16d   : > { %p767_p2 = scmp.lt.u32.totalorder %s765_s12, %s761_s10  ;;  %p769_p5 = scmp.lt.u32.totalorder %s761_s10, %s1048_s21 }
 0x16e   : > { %p763_p13 = pnand %p762_p12, %p966_p3 }
 0x16f   : > { %p768_p4 = por %p767_p2, %p766_p1 }
 0x170   : > { %p764_p0 = pneg %p763_p13 }
 0x171   : > { %p770_p6 = por %p769_p5, %p768_p4 }
 0x173   : > { %p771_p7 = pnand %p770_p6, %p764_p0 }
 0x175   : > { %774 = shalt.err (!%p771_p7)
}
 0x176   : > { %s1159_s14 = scalar_lea.sflag [#allocation5], %s1041_s16  ;;  %s1089_s22 = scalar_lea.hbm %s1152_s5, %s1006_s26 }
 0x177   : > { %634 = dma.vmem_to_hbm [thread:$0]  (%p966_p3), %s1050_s17, 128, %s1048_s21, %s1159_s14   ;;  %v377_v14 = vpop.permute.xlu0 %376 }
 0x178   : > { %s1160_s10 = scalar_lea.vmem [#allocation6], %s999_s13  ;;  %s775_s8 = scalar_lea.vmem %s1083_s9, 128 }
 0x179   : > { %379 = vst.msk [vmem:[%s1160_s10] sm:$0xff] %vm369_vm2, %v377_v14  ;;  %p776_p9 = scmp.ne.s32.totalorder %s1083_s9, %s775_s8  ;;  %s882_s17 = smov [#allocation6]  }
 0x17a   : > { %s779_s21 = sshll.u32 %s882_s17, 4  ;;  %s780_s21 = int_to_ptr.vmem [resolvable:$false] %s779_s21 }
 0x17b   : > { %p777_p10 = pnand %p776_p9, %p966_p3  ;;  %s781_s12 = scalar_lea.vmem %s780_s21, 256 }
 0x17c   : > { %p782_p12 = scmp.lt.s32.totalorder %s1083_s9, %s780_s21  ;;  %p783_p13 = scmp.lt.s32.totalorder %s781_s12, %s775_s8 }
 0x17d   : > { %p778_p11 = pneg %p777_p10 }
 0x17e   : > { %p784_p0 = por %p783_p13, %p782_p12 }
 0x180   : > { %p785_p1 = pnand %p784_p0, %p778_p11 }
 0x182   : > { %788 = shalt.err (!%p785_p1)
}
 0x183   : > { %s789_s26 = scalar_lea.hbm %s1089_s22, 128  ;;  %s793_s14 = scalar_lea.hbm %s1152_s5, 1024 }
 0x184   : > { %p790_p2 = scmp.ne.s32.totalorder %s1089_s22, %s789_s26  ;;  %p794_p6 = scmp.lt.u32.totalorder %s1089_s22, %s1152_s5 }
 0x185   : > { %p795_p7 = scmp.lt.u32.totalorder %s793_s14, %s789_s26  ;;  %p797_p10 = scmp.lt.u32.totalorder %s789_s26, %s1089_s22 }
 0x186   : > { %p791_p4 = pnand %p790_p2, %p966_p3 }
 0x187   : > { %p796_p9 = por %p795_p7, %p794_p6 }
 0x188   : > { %p792_p5 = pneg %p791_p4 }
 0x189   : > { %p798_p11 = por %p797_p10, %p796_p9 }
 0x18b   : > { %p799_p12 = pnand %p798_p11, %p792_p5 }
 0x18d   : > { %802 = shalt.err (!%p799_p12)
}
 0x18e   : > { %s1161_s10 = scalar_lea.sflag [#allocation5], %s1041_s16 }
 0x18f   : > { %635 = dma.vmem_to_hbm [thread:$0]  (%p966_p3), %s1083_s9, 128, %s1089_s22, %s1161_s10  }
 0x190 PF: > { %p649_p13 = scmp.ge.s32.totalorder %s873_s25, 2  ;;  %s451_s8 = sand.u32 1, %s845_s18  }
 0x191   : > { %s452_s17 = scalar_lea.sflag [#allocation3], %s451_s8 }
 0x192   : > { %p640_p0 = pnand %p649_p13, %p977_p8 }
 0x194   : > { %836 = dma.done.wait (!%p640_p0), %s452_s17, 128  }
 0x195   : > { %838 = vsyncadd (!%p640_p0), %s452_s17, 4294967168  ;;  %s1162_s21 = sadd.s32 4294967294, %s873_s25  }
 0x196   : > { %s460_s12 = sand.u32 1, %s1162_s21  }
 0x197   : > { %s461_s6 = scalar_lea.sflag [#allocation5], %s460_s12 }
 0x198   : > { %840 = dma.done.wait (!%p640_p0), %s461_s6, 256  }
 0x199   : > { %842 = vsyncadd (!%p640_p0), %s461_s6, 4294967040  ;;  %s22_s25 = sadd.s32 1, %s873_s25   ;;  %s1163_s18 = smov %s849_s19 }
 0x19a   : > { %p19_p3 = scmp.ge.s32.totalorder %s22_s25, 10   ;;  %s1164_s19 = smov %s853_s20 }
 0x19b   : > { %s1165_s20 = smov %s986_s11  ;;  %s1166_s21 = smov %s865_s23 }
 0x19c   : > { %s1167_s22 = smov %s869_s24  ;;  %s1168_s23 = smov %s1171_s28 }
 0x19d   : > { %s1169_s24 = smov %s1175_s29  ;;  %21 = sbr.rel (!%p19_p3) target bundleno = 7 (0x7), region = 101 }
 0x1a4   :  { %475 = vsyncpa [#allocation3], 1 }
 0x1a5   :  { %477 = vsyncpa [#allocation3 + $0x1], 1 }
 0x1a6   :  { %478 = vsyncpa [#allocation5], 1 }
 0x1a7   :  { %480 = vsyncpa [#allocation5 + $0x1], 1 }

</bundles_post_ra>
